<compile_context>
chip_gen: v6e
topology: v6e:2x2x1
jax: 0.10.0
libtpu: 0.0.40
codegen_flags: <defaults>
</compile_context>

<pallas_src>
import functools

import jax
import jax.numpy as jnp
from jax.experimental import pallas as pl
from jax.experimental.pallas import tpu as pltpu

# ---- small, module-consistent shapes -------------------------------------------------
L0 = 16       # length of sequence z0 (spatial H of C)
L1 = 16       # length of sequence z1 (spatial W of C)
D = 32        # embedding dim
C_OUT = 64    # contact.output_dim
HID = 32      # hidden_dim of the interaction MLP
K_ACT = 10.0  # activation_k
X0 = 0.5      # LogisticActivation midpoint


def interaction_kernel(z_ref, wc_ref, w1_ref, slab_ref, out_ref, *, l0, l1):
    """One (z0, z1) pair per grid step.

    z_ref    : (l0 + l1, 2D) f32. Rows [0,l0) = [z0_i | z0_i]; rows [l0,l0+l1) = [z1_j | z1_j].
    wc_ref   : (2D, C_OUT) bf16 = [wcd ; wcp]   (contact weight, stacked).
    w1_ref   : (C_OUT, HID) f32                 (dense1 weight).
    slab_ref : (2, 128) f32. Row 0 = [bc | b1 | w2]; row 1 = [b2, k, 0, ...].
    out_ref  : (1, 1) f32.
    """
    two_d = z_ref.shape[1]
    d = two_d // 2
    c_out = wc_ref.shape[1]
    hid = w1_ref.shape[1]
    m = l0 * l1

    z = z_ref[...]                                   # (l0+l1, 2D) f32, ~8 KiB, vreg resident
    z1c = z[l0:l0 + l1, :]                           # (l1, 2D)

    # e1x[r] = z1c[r % l1]  -- tile along the (cheap, sublane-tile-aligned) major dim.
    e1x = jnp.concatenate([z1c] * l0, axis=0)        # (m, 2D)
    # e0x[r] = z0c[r // l1] -- per-row sublane broadcast, then major-dim concat (in-kernel,
    # replaces the wrapper-side 32x row replication of the previous version).
    e0x = jnp.concatenate(
        [jnp.broadcast_to(z[i:i + 1, :], (l1, two_d)) for i in range(l0)], axis=0)  # (m, 2D)

    # Fused contact features: lanes [0,d) = |e0_i - e1_j| (hit wcd rows),
    #                         lanes [d,2d) = e0_i * e1_j  (hit wcp rows).
    # Kept in f32: v5e has no bf16 VPU path.  (bf16 feature math is a v6e/v7x-only tweak.)
    lane = jax.lax.broadcasted_iota(jnp.int32, (m, two_d), 1)
    feat = jnp.where(lane < d, jnp.abs(e0x - e1x), e0x * e1x)       # (m, 2D) f32

    # Packed parameter slab: static lane slices are free (no extra operand DMAs).
    slab = slab_ref[...]
    bc = slab[0:1, 0:c_out]                          # (1, C_OUT)
    b1 = slab[0:1, c_out:c_out + hid]                # (1, HID)
    w2r = slab[0:1, c_out + hid:c_out + 2 * hid]     # (1, HID)
    b2 = slab[1:2, 0:1]                              # (1, 1)
    k = slab[1:2, 1:2]                               # (1, 1)

    # Single fused MXU matmul (bf16 operands, f32 accumulation) + bias + ReLU.
    c = jnp.dot(feat.astype(jnp.bfloat16), wc_ref[...],
                preferred_element_type=jnp.float32) + bc            # (m, C_OUT)
    c = jnp.maximum(c, 0.0)

    # Global max pool over all (i, j) spatial positions (layout-invariant).
    gp = jnp.max(c, axis=0, keepdims=True)                          # (1, C_OUT)

    # Interaction MLP (f32; tiny).
    # TODO(synk): Dropout(p=0.5) layers are identity in eval mode; training-mode RNG drop not implemented.
    h = jnp.maximum(
        jnp.dot(gp, w1_ref[...], preferred_element_type=jnp.float32) + b1, 0.0)
    y = jnp.sum(h * w2r, axis=1, keepdims=True) + b2                # (1, 1)

    # LogisticActivation(x0=0.5, k): reciprocal on the EUP slot (approx, single element).
    phat = pl.reciprocal(1.0 + jnp.exp(-k * (y - X0)), approx=True)
    out_ref[...] = jnp.clip(phat, 0.0, 1.0)


def _pack_operands(z0_b, z1_b, wcd, wcp, bc, w1, b1, w2, b2, k_arr):
    """Tiny layout plumbing (a few KiB): lane-duplicate z, stack wc, pack all biases/scalars."""
    # z slab: (B, L0+L1, 2D); rows [0,L0) = [z0_i|z0_i], rows [L0,L0+L1) = [z1_j|z1_j].
    z0c = jnp.concatenate([z0_b, z0_b], axis=-1)
    z1c = jnp.concatenate([z1_b, z1_b], axis=-1)
    z = jnp.concatenate([z0c, z1c], axis=1).astype(jnp.float32)

    wc = jnp.concatenate([wcd, wcp], axis=0).astype(jnp.bfloat16)    # (2D, C_OUT)

    c_out = wcd.shape[1]
    hid = w1.shape[1]
    width = max(128, c_out + 2 * hid)                                # lane-dense slab row
    row0 = jnp.concatenate([bc.reshape(1, c_out), b1.reshape(1, hid),
                            w2.reshape(1, hid)], axis=1)
    row0 = jnp.pad(row0, ((0, 0), (0, width - row0.shape[1])))
    row1 = jnp.concatenate([b2.reshape(1, 1), k_arr.reshape(1, 1),
                            jnp.zeros((1, width - 2), jnp.float32)], axis=1)
    slab = jnp.concatenate([row0, row1], axis=0).astype(jnp.float32)  # (2, width)
    return z, wc, w1.astype(jnp.float32), slab


@jax.jit
def model_interaction_forward_batched(z0_b, z1_b, wcd, wcp, bc, w1, b1, w2, b2, k_arr):
    """Batched ModelInteraction.forward over B independent (z0, z1) pairs -> (B,) phat."""
    batch, l0, d = z0_b.shape
    l1 = z1_b.shape[1]
    c_out = wcd.shape[1]
    hid = w1.shape[1]
    m = l0 * l1

    z, wc, w1f, slab = _pack_operands(z0_b, z1_b, wcd, wcp, bc, w1, b1, w2, b2, k_arr)
    operands = (z, wc, w1f, slab)

    # Honest advisory cost (de-replicated byte counts).
    cost = pl.CostEstimate(
        flops=int(batch * (2 * m * (2 * d) * c_out + 2 * c_out * hid + 2 * hid)),
        transcendentals=int(batch),
        bytes_accessed=int(sum(x.size * x.dtype.itemsize for x in operands) + batch * 4),
    )

    kernel = functools.partial(interaction_kernel, l0=l0, l1=l1)
    out = pl.pallas_call(
        kernel,
        out_shape=jax.ShapeDtypeStruct((batch, 1, 1), jnp.float32),
        grid=(batch,),
        in_specs=[
            pl.BlockSpec((None, l0 + l1, 2 * d), lambda b: (b, 0, 0)),   # per-pair z slab
            pl.BlockSpec((2 * d, c_out), lambda b: (0, 0)),              # shared weights stay
            pl.BlockSpec((c_out, hid), lambda b: (0, 0)),                #   resident (same block
            pl.BlockSpec(slab.shape, lambda b: (0, 0)),                  #   index every step)
        ],
        out_specs=pl.BlockSpec((None, 1, 1), lambda b: (b, 0, 0)),
        compiler_params=pltpu.CompilerParams(
            dimension_semantics=("parallel",)),                          # both v7x TCs on batch
        cost_estimate=cost,
    )(*operands)
    return out[:, 0, 0]


@jax.jit
def model_interaction_forward(z0, z1, wcd, wcp, bc, w1, b1, w2, b2, k_arr):
    """ModelInteraction.forward(z0, z1) -> scalar phat (embedding=None, global_pool='max')."""
    phat = model_interaction_forward_batched(z0[None], z1[None],
                                             wcd, wcp, bc, w1, b1, w2, b2, k_arr)
    return phat[0]   # .squeeze()


def reference_forward(z0, z1, wcd, wcp, bc, w1, b1, w2, b2, k):
    """Pure-JAX reference mirroring the PyTorch forward (eval mode) with the same
    bf16-operand / f32-accumulate precision choice for the contact matmul."""
    m = z0.shape[0] * z1.shape[0]
    diff = jnp.abs(z0[:, None, :] - z1[None, :, :]).reshape(m, -1)
    prod = (z0[:, None, :] * z1[None, :, :]).reshape(m, -1)
    feat = jnp.concatenate([diff, prod], axis=1)
    wc = jnp.concatenate([wcd, wcp], axis=0)
    C = jnp.maximum(
        jnp.dot(feat.astype(jnp.bfloat16), wc.astype(jnp.bfloat16),
                preferred_element_type=jnp.float32) + bc, 0.0)
    gp = jnp.max(C, axis=0, keepdims=True)                # global max pool -> (1, C_OUT)
    h = jnp.maximum(gp @ w1 + b1, 0.0)
    y = h @ w2 + b2
    phat = jnp.clip(1.0 / (1.0 + jnp.exp(-k * (y - X0))), 0.0, 1.0)
    return phat[0, 0]


if __name__ == "__main__":
    key = jax.random.PRNGKey(0)
    ks = jax.random.split(key, 11)

    # inputs (embedding=None so z == e)
    z0 = jax.random.normal(ks[0], (L0, D), dtype=jnp.float32)
    z1 = jax.random.normal(ks[1], (L1, D), dtype=jnp.float32)

    # deterministic synthetic parameters
    wcd = jax.random.normal(ks[2], (D, C_OUT), dtype=jnp.float32) * 0.1
    wcp = jax.random.normal(ks[3], (D, C_OUT), dtype=jnp.float32) * 0.1
    bc = jax.random.normal(ks[4], (1, C_OUT), dtype=jnp.float32) * 0.1
    w1 = jax.random.normal(ks[5], (C_OUT, HID), dtype=jnp.float32) * 0.1
    b1 = jax.random.normal(ks[6], (1, HID), dtype=jnp.float32) * 0.1
    w2 = jax.random.normal(ks[7], (HID, 1), dtype=jnp.float32) * 0.1
    b2 = jax.random.normal(ks[8], (1, 1), dtype=jnp.float32) * 0.1
    k_arr = jnp.full((1,), K_ACT, dtype=jnp.float32)

    # single-pair forward (module semantics)
    phat = model_interaction_forward(z0, z1, wcd, wcp, bc, w1, b1, w2, b2, k_arr)
    phat = jax.block_until_ready(phat)
    ref = reference_forward(z0, z1, wcd, wcp, bc, w1, b1, w2, b2, K_ACT)
    assert jnp.allclose(phat, ref, rtol=5e-3, atol=5e-3), (phat, ref)

    # batched forward (grid=(B,), "parallel" axis -> megacore sharding + pipelined DMA)
    B = 4
    z0_b = jax.random.normal(ks[9], (B, L0, D), dtype=jnp.float32)
    z1_b = jax.random.normal(ks[10], (B, L1, D), dtype=jnp.float32)
    phat_b = model_interaction_forward_batched(z0_b, z1_b, wcd, wcp, bc, w1, b1, w2,
                                               b2, k_arr)
    phat_b = jax.block_until_ready(phat_b)
    ref_b = jnp.stack([reference_forward(z0_b[i], z1_b[i], wcd, wcp, bc, w1, b1, w2,
                                         b2, K_ACT) for i in range(B)])
    assert jnp.allclose(phat_b, ref_b, rtol=5e-3, atol=5e-3), (phat_b, ref_b)

    print("KERNEL_OK")
</pallas_src>

<mosaic_0001>
module attributes {stable_mosaic.version = 11 : i64} {
  func.func @interaction_kernel(%arg0: i32, %arg1: memref<1x32x64xf32, #tpu.memory_space<vmem>>, %arg2: memref<64x64xbf16, #tpu.memory_space<vmem>>, %arg3: memref<64x32xf32, #tpu.memory_space<vmem>>, %arg4: memref<2x128xf32, #tpu.memory_space<vmem>>, %arg5: memref<1x1x1xf32, #tpu.memory_space<vmem>>) attributes {dimension_semantics = [#tpu.dimension_semantics<parallel>], iteration_bounds = array<i64: 1>, scalar_prefetch = 0 : i64, scratch_operands = 0 : i64, tpu.core_type = #tpu.core_type<tc>, window_params = [{transform_indices = @transform_0, window_bounds = array<i64: 1, 32, 64>}, {pipeline_mode = #tpu.pipeline_mode<synchronous>, transform_indices = @transform_1, window_bounds = array<i64: 64, 64>}, {pipeline_mode = #tpu.pipeline_mode<synchronous>, transform_indices = @transform_2, window_bounds = array<i64: 64, 32>}, {pipeline_mode = #tpu.pipeline_mode<synchronous>, transform_indices = @transform_3, window_bounds = array<i64: 2, 128>}, {transform_indices = @transform_4, window_bounds = array<i64: 1, 1, 1>}]} {
    %c0 = arith.constant 0 : index
    %c0_0 = arith.constant 0 : index
    %c0_1 = arith.constant 0 : index
    %0 = vector.load %arg1[%c0, %c0_0, %c0_1] : memref<1x32x64xf32, #tpu.memory_space<vmem>>, vector<1x32x64xf32>
    %1 = vector.shape_cast %0 : vector<1x32x64xf32> to vector<32x64xf32>
    %2 = vector.extract_strided_slice %1 {offsets = [16, 0], sizes = [16, 64], strides = [1, 1]} : vector<32x64xf32> to vector<16x64xf32>
    %3 = tpu.concatenate %2, %2, %2, %2, %2, %2, %2, %2, %2, %2, %2, %2, %2, %2, %2, %2 in 0 : vector<16x64xf32>, vector<16x64xf32>, vector<16x64xf32>, vector<16x64xf32>, vector<16x64xf32>, vector<16x64xf32>, vector<16x64xf32>, vector<16x64xf32>, vector<16x64xf32>, vector<16x64xf32>, vector<16x64xf32>, vector<16x64xf32>, vector<16x64xf32>, vector<16x64xf32>, vector<16x64xf32>, vector<16x64xf32> -> vector<256x64xf32>
    %4 = vector.extract_strided_slice %1 {offsets = [0, 0], sizes = [1, 64], strides = [1, 1]} : vector<32x64xf32> to vector<1x64xf32>
    %5 = vector.shape_cast %4 : vector<1x64xf32> to vector<1x64xf32>
    %6 = vector.broadcast %5 : vector<1x64xf32> to vector<16x64xf32>
    %7 = vector.extract_strided_slice %1 {offsets = [1, 0], sizes = [1, 64], strides = [1, 1]} : vector<32x64xf32> to vector<1x64xf32>
    %8 = vector.shape_cast %7 : vector<1x64xf32> to vector<1x64xf32>
    %9 = vector.broadcast %8 : vector<1x64xf32> to vector<16x64xf32>
    %10 = vector.extract_strided_slice %1 {offsets = [2, 0], sizes = [1, 64], strides = [1, 1]} : vector<32x64xf32> to vector<1x64xf32>
    %11 = vector.shape_cast %10 : vector<1x64xf32> to vector<1x64xf32>
    %12 = vector.broadcast %11 : vector<1x64xf32> to vector<16x64xf32>
    %13 = vector.extract_strided_slice %1 {offsets = [3, 0], sizes = [1, 64], strides = [1, 1]} : vector<32x64xf32> to vector<1x64xf32>
    %14 = vector.shape_cast %13 : vector<1x64xf32> to vector<1x64xf32>
    %15 = vector.broadcast %14 : vector<1x64xf32> to vector<16x64xf32>
    %16 = vector.extract_strided_slice %1 {offsets = [4, 0], sizes = [1, 64], strides = [1, 1]} : vector<32x64xf32> to vector<1x64xf32>
    %17 = vector.shape_cast %16 : vector<1x64xf32> to vector<1x64xf32>
    %18 = vector.broadcast %17 : vector<1x64xf32> to vector<16x64xf32>
    %19 = vector.extract_strided_slice %1 {offsets = [5, 0], sizes = [1, 64], strides = [1, 1]} : vector<32x64xf32> to vector<1x64xf32>
    %20 = vector.shape_cast %19 : vector<1x64xf32> to vector<1x64xf32>
    %21 = vector.broadcast %20 : vector<1x64xf32> to vector<16x64xf32>
    %22 = vector.extract_strided_slice %1 {offsets = [6, 0], sizes = [1, 64], strides = [1, 1]} : vector<32x64xf32> to vector<1x64xf32>
    %23 = vector.shape_cast %22 : vector<1x64xf32> to vector<1x64xf32>
    %24 = vector.broadcast %23 : vector<1x64xf32> to vector<16x64xf32>
    %25 = vector.extract_strided_slice %1 {offsets = [7, 0], sizes = [1, 64], strides = [1, 1]} : vector<32x64xf32> to vector<1x64xf32>
    %26 = vector.shape_cast %25 : vector<1x64xf32> to vector<1x64xf32>
    %27 = vector.broadcast %26 : vector<1x64xf32> to vector<16x64xf32>
    %28 = vector.extract_strided_slice %1 {offsets = [8, 0], sizes = [1, 64], strides = [1, 1]} : vector<32x64xf32> to vector<1x64xf32>
    %29 = vector.shape_cast %28 : vector<1x64xf32> to vector<1x64xf32>
    %30 = vector.broadcast %29 : vector<1x64xf32> to vector<16x64xf32>
    %31 = vector.extract_strided_slice %1 {offsets = [9, 0], sizes = [1, 64], strides = [1, 1]} : vector<32x64xf32> to vector<1x64xf32>
    %32 = vector.shape_cast %31 : vector<1x64xf32> to vector<1x64xf32>
    %33 = vector.broadcast %32 : vector<1x64xf32> to vector<16x64xf32>
    %34 = vector.extract_strided_slice %1 {offsets = [10, 0], sizes = [1, 64], strides = [1, 1]} : vector<32x64xf32> to vector<1x64xf32>
    %35 = vector.shape_cast %34 : vector<1x64xf32> to vector<1x64xf32>
    %36 = vector.broadcast %35 : vector<1x64xf32> to vector<16x64xf32>
    %37 = vector.extract_strided_slice %1 {offsets = [11, 0], sizes = [1, 64], strides = [1, 1]} : vector<32x64xf32> to vector<1x64xf32>
    %38 = vector.shape_cast %37 : vector<1x64xf32> to vector<1x64xf32>
    %39 = vector.broadcast %38 : vector<1x64xf32> to vector<16x64xf32>
    %40 = vector.extract_strided_slice %1 {offsets = [12, 0], sizes = [1, 64], strides = [1, 1]} : vector<32x64xf32> to vector<1x64xf32>
    %41 = vector.shape_cast %40 : vector<1x64xf32> to vector<1x64xf32>
    %42 = vector.broadcast %41 : vector<1x64xf32> to vector<16x64xf32>
    %43 = vector.extract_strided_slice %1 {offsets = [13, 0], sizes = [1, 64], strides = [1, 1]} : vector<32x64xf32> to vector<1x64xf32>
    %44 = vector.shape_cast %43 : vector<1x64xf32> to vector<1x64xf32>
    %45 = vector.broadcast %44 : vector<1x64xf32> to vector<16x64xf32>
    %46 = vector.extract_strided_slice %1 {offsets = [14, 0], sizes = [1, 64], strides = [1, 1]} : vector<32x64xf32> to vector<1x64xf32>
    %47 = vector.shape_cast %46 : vector<1x64xf32> to vector<1x64xf32>
    %48 = vector.broadcast %47 : vector<1x64xf32> to vector<16x64xf32>
    %49 = vector.extract_strided_slice %1 {offsets = [15, 0], sizes = [1, 64], strides = [1, 1]} : vector<32x64xf32> to vector<1x64xf32>
    %50 = vector.shape_cast %49 : vector<1x64xf32> to vector<1x64xf32>
    %51 = vector.broadcast %50 : vector<1x64xf32> to vector<16x64xf32>
    %52 = tpu.concatenate %6, %9, %12, %15, %18, %21, %24, %27, %30, %33, %36, %39, %42, %45, %48, %51 in 0 : vector<16x64xf32>, vector<16x64xf32>, vector<16x64xf32>, vector<16x64xf32>, vector<16x64xf32>, vector<16x64xf32>, vector<16x64xf32>, vector<16x64xf32>, vector<16x64xf32>, vector<16x64xf32>, vector<16x64xf32>, vector<16x64xf32>, vector<16x64xf32>, vector<16x64xf32>, vector<16x64xf32>, vector<16x64xf32> -> vector<256x64xf32>
    %53 = tpu.iota {dimensions = array<i32: 1>} : vector<256x64xi32>
    %c32_i32 = arith.constant 32 : i32
    %54 = vector.broadcast %c32_i32 : i32 to vector<256x64xi32>
    %55 = arith.cmpi slt, %53, %54 : vector<256x64xi32>
    %56 = arith.subf %52, %3 : vector<256x64xf32>
    %57 = math.absf %56 : vector<256x64xf32>
    %58 = arith.mulf %52, %3 : vector<256x64xf32>
    %59 = arith.select %55, %57, %58 : vector<256x64xi1>, vector<256x64xf32>
    %c0_2 = arith.constant 0 : index
    %c0_3 = arith.constant 0 : index
    %60 = vector.load %arg4[%c0_2, %c0_3] : memref<2x128xf32, #tpu.memory_space<vmem>>, vector<2x128xf32>
    %61 = vector.extract_strided_slice %60 {offsets = [0, 0], sizes = [1, 64], strides = [1, 1]} : vector<2x128xf32> to vector<1x64xf32>
    %62 = vector.extract_strided_slice %60 {offsets = [0, 64], sizes = [1, 32], strides = [1, 1]} : vector<2x128xf32> to vector<1x32xf32>
    %63 = vector.extract_strided_slice %60 {offsets = [0, 96], sizes = [1, 32], strides = [1, 1]} : vector<2x128xf32> to vector<1x32xf32>
    %64 = vector.extract_strided_slice %60 {offsets = [1, 0], sizes = [1, 1], strides = [1, 1]} : vector<2x128xf32> to vector<1x1xf32>
    %65 = vector.extract_strided_slice %60 {offsets = [1, 1], sizes = [1, 1], strides = [1, 1]} : vector<2x128xf32> to vector<1x1xf32>
    %66 = arith.truncf %59 : vector<256x64xf32> to vector<256x64xbf16>
    %c0_4 = arith.constant 0 : index
    %c0_5 = arith.constant 0 : index
    %67 = vector.load %arg2[%c0_4, %c0_5] : memref<64x64xbf16, #tpu.memory_space<vmem>>, vector<64x64xbf16>
    %cst = arith.constant dense<0.000000e+00> : vector<256x64xf32>
    %68 = tpu.matmul %66, %67, %cst {dimension_numbers = #tpu.dot_dimension_numbers<[1], [0], [0], [1], [0, 0, 1, 1], [], []>} : vector<256x64xbf16>, vector<64x64xbf16>, vector<256x64xf32> -> vector<256x64xf32>
    %69 = vector.broadcast %61 : vector<1x64xf32> to vector<256x64xf32>
    %70 = arith.addf %68, %69 : vector<256x64xf32>
    %cst_6 = arith.constant 0.000000e+00 : f32
    %71 = vector.broadcast %cst_6 : f32 to vector<256x64xf32>
    %72 = arith.maximumf %70, %71 : vector<256x64xf32>
    %cst_7 = arith.constant dense<0xFF800000> : vector<64xf32>
    %73 = vector.multi_reduction <maximumf>, %72, %cst_7 [0] : vector<256x64xf32> to vector<64xf32>
    %74 = vector.shape_cast %73 : vector<64xf32> to vector<1x64xf32>
    %c0_8 = arith.constant 0 : index
    %c0_9 = arith.constant 0 : index
    %75 = vector.load %arg3[%c0_8, %c0_9] : memref<64x32xf32, #tpu.memory_space<vmem>>, vector<64x32xf32>
    %cst_10 = arith.constant dense<0.000000e+00> : vector<1x32xf32>
    %76 = tpu.matmul %74, %75, %cst_10 {dimension_numbers = #tpu.dot_dimension_numbers<[1], [0], [0], [1], [0, 0, 1, 1], [], []>} : vector<1x64xf32>, vector<64x32xf32>, vector<1x32xf32> -> vector<1x32xf32>
    %77 = arith.addf %76, %62 : vector<1x32xf32>
    %cst_11 = arith.constant 0.000000e+00 : f32
    %78 = vector.broadcast %cst_11 : f32 to vector<1x32xf32>
    %79 = arith.maximumf %77, %78 : vector<1x32xf32>
    %80 = arith.mulf %79, %63 : vector<1x32xf32>
    %cst_12 = arith.constant dense<0.000000e+00> : vector<1xf32>
    %81 = vector.multi_reduction <add>, %80, %cst_12 [1] : vector<1x32xf32> to vector<1xf32>
    %82 = vector.shape_cast %81 : vector<1xf32> to vector<1x1xf32>
    %83 = arith.addf %82, %64 : vector<1x1xf32>
    %cst_13 = arith.constant 0.000000e+00 : f32
    %84 = vector.broadcast %cst_13 : f32 to vector<1x1xf32>
    %85 = arith.subf %84, %65 : vector<1x1xf32>
    %cst_14 = arith.constant 5.000000e-01 : f32
    %86 = vector.broadcast %cst_14 : f32 to vector<1x1xf32>
    %87 = arith.subf %83, %86 : vector<1x1xf32>
    %88 = arith.mulf %85, %87 : vector<1x1xf32>
    %89 = math.exp %88 : vector<1x1xf32>
    %cst_15 = arith.constant 1.000000e+00 : f32
    %90 = vector.broadcast %cst_15 : f32 to vector<1x1xf32>
    %91 = arith.addf %90, %89 : vector<1x1xf32>
    %92 = tpu.reciprocal %91 {approx = true} : vector<1x1xf32> -> vector<1x1xf32>
    %cst_16 = arith.constant 0.000000e+00 : f32
    %cst_17 = arith.constant 1.000000e+00 : f32
    %93 = vector.broadcast %cst_16 : f32 to vector<1x1xf32>
    %94 = arith.maximumf %93, %92 : vector<1x1xf32>
    %95 = vector.broadcast %cst_17 : f32 to vector<1x1xf32>
    %96 = arith.minimumf %95, %94 : vector<1x1xf32>
    %c0_18 = arith.constant 0 : index
    %c0_19 = arith.constant 0 : index
    %c0_20 = arith.constant 0 : index
    %97 = vector.load %arg5[%c0_18, %c0_19, %c0_20] : memref<1x1x1xf32, #tpu.memory_space<vmem>>, vector<1x1x1xf32>
    %98 = vector.shape_cast %97 : vector<1x1x1xf32> to vector<1x1xf32>
    %99 = vector.shape_cast %96 : vector<1x1xf32> to vector<1x1x1xf32>
    tpu.vector_store %arg5[%c0_18, %c0_19, %c0_20], %99 {strides = array<i32>} : memref<1x1x1xf32, #tpu.memory_space<vmem>>, vector<1x1x1xf32>,
    return
  }
  func.func @transform_0(%arg0: i32) -> (i32, i32, i32) {
    %c0_i32 = arith.constant 0 : i32
    %c0_i32_0 = arith.constant 0 : i32
    %c0_i32_1 = arith.constant 0 : i32
    return %arg0, %c0_i32, %c0_i32_0 : i32, i32, i32
  }
  func.func @transform_1(%arg0: i32) -> (i32, i32) {
    %c0_i32 = arith.constant 0 : i32
    %c0_i32_0 = arith.constant 0 : i32
    %c0_i32_1 = arith.constant 0 : i32
    return %c0_i32, %c0_i32_0 : i32, i32
  }
  func.func @transform_2(%arg0: i32) -> (i32, i32) {
    %c0_i32 = arith.constant 0 : i32
    %c0_i32_0 = arith.constant 0 : i32
    %c0_i32_1 = arith.constant 0 : i32
    return %c0_i32, %c0_i32_0 : i32, i32
  }
  func.func @transform_3(%arg0: i32) -> (i32, i32) {
    %c0_i32 = arith.constant 0 : i32
    %c0_i32_0 = arith.constant 0 : i32
    %c0_i32_1 = arith.constant 0 : i32
    return %c0_i32, %c0_i32_0 : i32, i32
  }
  func.func @transform_4(%arg0: i32) -> (i32, i32, i32) {
    %c0_i32 = arith.constant 0 : i32
    %c0_i32_0 = arith.constant 0 : i32
    %c0_i32_1 = arith.constant 0 : i32
    return %arg0, %c0_i32, %c0_i32_0 : i32, i32, i32
  }
}

</mosaic_0001>

<bundles_post_ra>
// kernel: model_interaction_forward_batched.1
= control target key start
LH: loop header
LB: loop body
LE: loop exit
PB: predicated region body
PF: predicated region fallthrough
CT: control target
= control target key end

     0   :  { %v23_v1 = vlaneseq  ;;  %vm271_vm0 = vcmask 523264   ;;  %s1252_s0 = inlined_call_operand.vmem [shape: f32[1,32,64], index: 0, kind: input, shape index: {}]   ;;  %s1253_s1 = inlined_call_operand.vmem [shape: bf16[64,64], index: 1, kind: input, shape index: {}]   ;;  %s1254_s2 = inlined_call_operand.vmem [shape: f32[64,32], index: 2, kind: input, shape index: {}]   ;;  %s1255_s3 = inlined_call_operand.vmem [shape: f32[2,128], index: 3, kind: input, shape index: {}]   ;;  %s1256_s4 = inlined_call_operand.hbm [shape: f32[1,1,1], index: 4, kind: output, shape index: {}]  }
   0x1   :  { %v838_v0 = vld [vmem:[%s1253_s1 + $0x18] sm:$0xff]   ;;  %v839_v2 = vld [vmem:[%s1253_s1 + $0x10] sm:$0xff]   ;;  %v840_v5 = vld [vmem:[%s1253_s1 + $0x8] sm:$0xff]  }
   0x2   :  { %764 = vmatprep.subr.bf16.mxu0 %v838_v0  ;;  %v906_v3 = vshrl.u32 %v23_v1, 7  ;;  %823 = vmatprep.subr.bf16.mxu1 %v838_v0  ;;  %v908_v4 = vand.u32 127, %v23_v1  ;;  %v916_v6 = vld [vmem:[%s1252_s0] sm:$0xff]  ;;  %v926_v10 = vld [vmem:[%s1252_s0 + $0x10] sm:$0xff]  ;;  %v931_v11 = vld [vmem:[%s1252_s0 + $0x18] sm:$0xff] }
   0x3   :  { %765 = vmatpush3.bf16.msra.mxu0 %v838_v0  ;;  %827 = vmatpush3.bf16.msra.mxu1 %v838_v0  ;;  %v938_v14 = vld [vmem:[%s1252_s0 + $0x8] sm:$0xff] }
   0x4   :  { %766 = vmatprep.subr.bf16.mxu0 %v839_v2  ;;  %v919_v7 = vsub.s32 0, %v906_v3  ;;  %v29_v8 = vsub.s32 1, %v906_v3  ;;  %824 = vmatprep.subr.bf16.mxu1 %v839_v2  ;;  %v33_v9 = vsub.s32 2, %v906_v3  ;;  %v37_v12 = vsub.s32 3, %v906_v3 }
   0x5   :  { %v41_v13 = vsub.s32 4, %v906_v3  ;;  %vm89_vm1 = vcmp.lt.s32.totalorder %v908_v4, 32 }
   0x6   :  { %v26_v15 = vrot.slane %v916_v6, %v919_v7  ;;  %v30_v16 = vrot.slane %v916_v6, %v29_v8  ;;  %v34_v17 = vrot.slane %v916_v6, %v33_v9 }
   0x7   :  { %9 = vsyncpa [#allocation3], 0  ;;  %767 = vmatpush3.bf16.msra.mxu0 %v839_v2  ;;  %828 = vmatpush3.bf16.msra.mxu1 %v839_v2  ;;  %v38_v18 = vrot.slane %v916_v6, %v37_v12  ;;  %v42_v19 = vrot.slane %v916_v6, %v41_v13  ;;  %v66_v20 = vrot.slane %v938_v14, %v33_v9  ;;  %v45_v21 = vsub.s32 5, %v906_v3  ;;  %v841_v22 = vld [vmem:[%s1253_s1] sm:$0xff]   ;;  %v587_v4 = vld [vmem:[%s1254_s2 + $0x28] sm:$0xff]  ;;  %s870_s21 = smov 64  }
   0x8   :  { %768 = vmatprep.subr.bf16.mxu0 %v840_v5  ;;  %v90_v23 = vsub.f32 %v26_v15, %v926_v10  ;;  %v91_v24 = vsub.f32 %v26_v15, %v931_v11  ;;  %v154_v25 = vmul.f32 %v26_v15, %v926_v10  ;;  %v155_v26 = vmul.f32 %v26_v15, %v931_v11  ;;  %s871_s22 = smov 32   ;;  %s874_s23 = smov [#allocation2]  }
   0x9   :  { %v92_v27 = vsub.f32 %v30_v16, %v926_v10  ;;  %v93_v28 = vsub.f32 %v30_v16, %v931_v11  ;;  %v156_v29 = vmul.f32 %v30_v16, %v926_v10  ;;  %v157_v30 = vmul.f32 %v30_v16, %v931_v11  ;;  %825 = vmatprep.subr.bf16.mxu1 %v840_v5  ;;  %s705_s24 = sshll.u32 %s874_s23, 4  ;;  %s706_s24 = int_to_ptr.vmem [resolvable:$true] %s705_s24 }
   0xa   :  { %v122_v31 = vand.u32 2147483647, %v90_v23  ;;  %v123_v32 = vand.u32 2147483647, %v91_v24  ;;  %v94_v33 = vsub.f32 %v34_v17, %v926_v10  ;;  %v95_v34 = vsub.f32 %v34_v17, %v931_v11  ;;  %s846_s25 = scalar_lea.vmem %s706_s24, 16  ;;  %s850_s26 = scalar_lea.vmem %s706_s24, 32 }
   0xb   :  { %769 = vmatpush3.bf16.msra.mxu0 %v840_v5  ;;  %v124_v35 = vand.u32 2147483647, %v92_v27  ;;  %v125_v36 = vand.u32 2147483647, %v93_v28  ;;  %v158_v37 = vmul.f32 %v34_v17, %v926_v10  ;;  %v159_v38 = vmul.f32 %v34_v17, %v931_v11  ;;  %829 = vmatpush3.bf16.msra.mxu1 %v840_v5  ;;  %p847_p0 = scmp.ne.s32.totalorder %s706_s24, %s846_s25  ;;  %p851_p1 = scmp.lt.s32.totalorder %s706_s24, %s706_s24 }
   0xc   :  { %770 = vmatprep.subr.bf16.mxu0 %v841_v22  ;;  %v186_v39 = vsel %vm89_vm1, %v122_v31, %v154_v25  ;;  %v187_v40 = vsel %vm89_vm1, %v123_v32, %v155_v26  ;;  %v126_v41 = vand.u32 2147483647, %v94_v33  ;;  %v127_v42 = vand.u32 2147483647, %v95_v34  ;;  %826 = vmatprep.subr.bf16.mxu1 %v841_v22  ;;  %p852_p2 = scmp.lt.s32.totalorder %s850_s26, %s846_s25 }
   0xd   :  { %v219_v43 = vpack.c.bf16 %v187_v40, %v186_v39  ;;  %v188_v44 = vsel %vm89_vm1, %v124_v35, %v156_v29  ;;  %v189_v45 = vsel %vm89_vm1, %v125_v36, %v157_v30  ;;  %v96_v46 = vsub.f32 %v38_v18, %v926_v10 }
   0xe   :  { %v220_v47 = vpack.c.bf16 %v189_v45, %v188_v44  ;;  %v190_v48 = vsel %vm89_vm1, %v126_v41, %v158_v37  ;;  %v191_v49 = vsel %vm89_vm1, %v127_v42, %v159_v38  ;;  %v97_v50 = vsub.f32 %v38_v18, %v931_v11  ;;  %p853_p3 = por %p852_p2, %p851_p1 }
   0xf   :  { %771 = vmatpush3.bf16.msra.mxu0 %v841_v22  ;;  %772 = vmatprep.mubr.msk.bf16.mxu0 %vm271_vm0, %v219_v43  ;;  %v221_v51 = vpack.c.bf16 %v191_v49, %v190_v48  ;;  %v128_v52 = vand.u32 2147483647, %v96_v46  ;;  %v160_v53 = vmul.f32 %v38_v18, %v926_v10  ;;  %v161_v54 = vmul.f32 %v38_v18, %v931_v11 }
  0x10   :  { %v129_v55 = vand.u32 2147483647, %v97_v50  ;;  %830 = vmatpush3.bf16.msra.mxu1 %v841_v22  ;;  %v98_v56 = vsub.f32 %v42_v19, %v926_v10  ;;  %v99_v57 = vsub.f32 %v42_v19, %v931_v11  ;;  %v162_v58 = vmul.f32 %v42_v19, %v926_v10  ;;  %p854_p4 = pnand %p853_p3, %p847_p0 }
  0x11   :  { %v192_v59 = vsel %vm89_vm1, %v128_v52, %v160_v53  ;;  %v163_v60 = vmul.f32 %v42_v19, %v931_v11  ;;  %v110_v61 = vsub.f32 %v66_v20, %v926_v10  ;;  %v111_v62 = vsub.f32 %v66_v20, %v931_v11 }
  0x12   :  { %773 = vmatmul.mubr.msk.bf16.vlgmr.msra.gmra.mxu0 %vm271_vm0, %v220_v47  ;;  %v193_v63 = vsel %vm89_vm1, %v129_v55, %v161_v54  ;;  %v130_v0 = vand.u32 2147483647, %v98_v56  ;;  %v131_v1 = vand.u32 2147483647, %v99_v57  ;;  %v174_v2 = vmul.f32 %v66_v20, %v926_v10 }
  0x13   :  { %776 = vmatprep.mubr.msk.bf16.mxu0 %vm271_vm0, %v221_v51  ;;  %v222_v5 = vpack.c.bf16 %v193_v63, %v192_v59  ;;  %v142_v9 = vand.u32 2147483647, %v110_v61  ;;  %v143_v15 = vand.u32 2147483647, %v111_v62  ;;  %v175_v16 = vmul.f32 %v66_v20, %v931_v11 }
  0x14   :  { %v194_v17 = vsel %vm89_vm1, %v130_v0, %v162_v58  ;;  %v195_v18 = vsel %vm89_vm1, %v131_v1, %v163_v60  ;;  %v46_v19 = vrot.slane %v916_v6, %v45_v21  ;;  %v70_v22 = vrot.slane %v938_v14, %v37_v12 }
  0x15   :  { %v223_v23 = vpack.c.bf16 %v195_v18, %v194_v17  ;;  %v206_v24 = vsel %vm89_vm1, %v142_v9, %v174_v2  ;;  %v207_v20 = vsel %vm89_vm1, %v143_v15, %v175_v16  ;;  %v49_v25 = vsub.s32 6, %v906_v3 }
  0x16   :  { %v229_v26 = vpack.c.bf16 %v207_v20, %v206_v24  ;;  %v100_v27 = vsub.f32 %v46_v19, %v926_v10  ;;  %v101_v28 = vsub.f32 %v46_v19, %v931_v11  ;;  %v164_v29 = vmul.f32 %v46_v19, %v926_v10 }
  0x17   :  { %v165_v30 = vmul.f32 %v46_v19, %v931_v11  ;;  %v112_v12 = vsub.f32 %v70_v22, %v926_v10  ;;  %v113_v31 = vsub.f32 %v70_v22, %v931_v11  ;;  %v176_v32 = vmul.f32 %v70_v22, %v926_v10 }
  0x18   :  { %792 = vmatprep.mubr.msk.bf16.mxu1 %vm271_vm0, %v229_v26  ;;  %v132_v33 = vand.u32 2147483647, %v100_v27  ;;  %v133_v34 = vand.u32 2147483647, %v101_v28  ;;  %v177_v35 = vmul.f32 %v70_v22, %v931_v11  ;;  %v50_v36 = vrot.slane %v916_v6, %v49_v25 }
  0x19   :  { %v144_v37 = vand.u32 2147483647, %v112_v12  ;;  %v145_v38 = vand.u32 2147483647, %v113_v31  ;;  %v74_v39 = vrot.slane %v938_v14, %v41_v13  ;;  %v53_v40 = vsub.s32 7, %v906_v3 }
  0x1a   :  { %777 = vmatmul.mubr.msk.bf16.gmra.mxu0 %vm271_vm0, %v222_v5  ;;  %v196_v41 = vsel %vm89_vm1, %v132_v33, %v164_v29  ;;  %v197_v42 = vsel %vm89_vm1, %v133_v34, %v165_v30  ;;  %v102_v43 = vsub.f32 %v50_v36, %v926_v10  ;;  %v103_v44 = vsub.f32 %v50_v36, %v931_v11 }
  0x1b   :  { %780 = vmatprep.mubr.msk.bf16.mxu0 %vm271_vm0, %v223_v23  ;;  %v224_v45 = vpack.c.bf16 %v197_v42, %v196_v41  ;;  %v208_v13 = vsel %vm89_vm1, %v144_v37, %v176_v32  ;;  %v209_v46 = vsel %vm89_vm1, %v145_v38, %v177_v35  ;;  %v166_v47 = vmul.f32 %v50_v36, %v926_v10 }
  0x1c   :  { %v230_v48 = vpack.c.bf16 %v209_v46, %v208_v13  ;;  %v134_v49 = vand.u32 2147483647, %v102_v43  ;;  %v135_v50 = vand.u32 2147483647, %v103_v44  ;;  %v167_v51 = vmul.f32 %v50_v36, %v931_v11 }
  0x1d   :  { %v114_v52 = vsub.f32 %v74_v39, %v926_v10  ;;  %v115_v53 = vsub.f32 %v74_v39, %v931_v11  ;;  %v178_v54 = vmul.f32 %v74_v39, %v926_v10  ;;  %v179_v55 = vmul.f32 %v74_v39, %v931_v11 }
  0x1e   :  { %793 = vmatmul.mubr.msk.bf16.vlgmr.msra.gmra.mxu1 %vm271_vm0, %v230_v48  ;;  %v198_v56 = vsel %vm89_vm1, %v134_v49, %v166_v47  ;;  %v199_v57 = vsel %vm89_vm1, %v135_v50, %v167_v51  ;;  %v54_v58 = vrot.slane %v916_v6, %v53_v40  ;;  %v78_v59 = vrot.slane %v938_v14, %v45_v21 }
  0x1f   :  { %v225_v60 = vpack.c.bf16 %v199_v57, %v198_v56  ;;  %v146_v61 = vand.u32 2147483647, %v114_v52  ;;  %v147_v62 = vand.u32 2147483647, %v115_v53  ;;  %v58_v63 = vrot.slane %v938_v14, %v919_v7 }
  0x20   :  { %v104_v0 = vsub.f32 %v54_v58, %v926_v10  ;;  %v105_v1 = vsub.f32 %v54_v58, %v931_v11  ;;  %v168_v2 = vmul.f32 %v54_v58, %v926_v10  ;;  %v169_v5 = vmul.f32 %v54_v58, %v931_v11 }
  0x21   :  { %v210_v6 = vsel %vm89_vm1, %v146_v61, %v178_v54  ;;  %v211_v21 = vsel %vm89_vm1, %v147_v62, %v179_v55  ;;  %v116_v9 = vsub.f32 %v78_v59, %v926_v10  ;;  %v117_v15 = vsub.f32 %v78_v59, %v931_v11 }
  0x22   :  { %781 = vmatmul.mubr.msk.bf16.gmra.mxu0 %vm271_vm0, %v224_v45  ;;  %v231_v16 = vpack.c.bf16 %v211_v21, %v210_v6  ;;  %v136_v17 = vand.u32 2147483647, %v104_v0  ;;  %v137_v18 = vand.u32 2147483647, %v105_v1  ;;  %v180_v19 = vmul.f32 %v78_v59, %v926_v10  ;;  %v588_v0 = vld [vmem:[%s1254_s2 + $0x30] sm:$0xff]  ;;  %v586_v1 = vld [vmem:[%s1254_s2 + $0x20] sm:$0xff] }
  0x23   :  { %784 = vmatprep.mubr.msk.bf16.mxu0 %vm271_vm0, %v225_v60  ;;  %v148_v22 = vand.u32 2147483647, %v116_v9  ;;  %v149_v23 = vand.u32 2147483647, %v117_v15  ;;  %v181_v24 = vmul.f32 %v78_v59, %v931_v11  ;;  %v106_v20 = vsub.f32 %v58_v63, %v926_v10  ;;  %v583_v6 = vld [vmem:[%s1254_s2 + $0x8] sm:$0xff]  ;;  %v582_v21 = vld [vmem:[%s1254_s2] sm:$0xff] }
  0x24   :  { %796 = vmatprep.mubr.msk.bf16.mxu1 %vm271_vm0, %v231_v16  ;;  %v200_v26 = vsel %vm89_vm1, %v136_v17, %v168_v2  ;;  %v201_v27 = vsel %vm89_vm1, %v137_v18, %v169_v5  ;;  %v107_v28 = vsub.f32 %v58_v63, %v931_v11  ;;  %v170_v29 = vmul.f32 %v58_v63, %v926_v10  ;;  %v585_v2 = vld [vmem:[%s1254_s2 + $0x18] sm:$0xff]  ;;  %v584_v5 = vld [vmem:[%s1254_s2 + $0x10] sm:$0xff]  ;;  %v1156_v9 = vld [vmem:[%s1255_s3] sm:$0x3]  ;;  %s873_s3 = smov 127  }
  0x25   :  { %v226_v30 = vpack.c.bf16 %v201_v27, %v200_v26  ;;  %v212_v12 = vsel %vm89_vm1, %v148_v22, %v180_v19  ;;  %v213_v31 = vsel %vm89_vm1, %v149_v23, %v181_v24  ;;  %v138_v32 = vand.u32 2147483647, %v106_v20  ;;  %591 = vrot.lane.b32.xlu0 %v1156_v9, %s870_s21 }
  0x26   :  { %v232_v33 = vpack.c.bf16 %v213_v31, %v212_v12  ;;  %v139_v34 = vand.u32 2147483647, %v107_v28  ;;  %v171_v35 = vmul.f32 %v58_v63, %v931_v11  ;;  %v82_v36 = vrot.slane %v938_v14, %v49_v25  ;;  %v589_v63 = vld [vmem:[%s1254_s2 + $0x38] sm:$0xff]  ;;  %s872_s2 = smov 1  }
  0x27   :  { %v202_v37 = vsel %vm89_vm1, %v138_v32, %v170_v29  ;;  %v62_v38 = vrot.slane %v938_v14, %v29_v8  ;;  %v86_v39 = vrot.slane %v938_v14, %v53_v40  ;;  %vm869_vm2 = vmmov 0  }
  0x28   :  { %797 = vmatmul.mubr.msk.bf16.gmra.mxu1 %vm271_vm0, %v232_v33  ;;  %v203_v41 = vsel %vm89_vm1, %v139_v34, %v171_v35  ;;  %v118_v42 = vsub.f32 %v82_v36, %v926_v10  ;;  %v119_v43 = vsub.f32 %v82_v36, %v931_v11  ;;  %v182_v25 = vmul.f32 %v82_v36, %v926_v10 }
  0x29   :  { %v227_v44 = vpack.c.bf16 %v203_v41, %v202_v37  ;;  %v183_v45 = vmul.f32 %v82_v36, %v931_v11  ;;  %v108_v3 = vsub.f32 %v62_v38, %v926_v10  ;;  %v109_v8 = vsub.f32 %v62_v38, %v931_v11  ;;  %668 = vrot.lane.b32.xlu0 %v1156_v9, %s871_s22 }
  0x2a   :  { %785 = vmatmul.mubr.msk.bf16.gmra.mxu0 %vm271_vm0, %v226_v30  ;;  %v150_v14 = vand.u32 2147483647, %v118_v42  ;;  %v151_v40 = vand.u32 2147483647, %v119_v43  ;;  %v172_v13 = vmul.f32 %v62_v38, %v926_v10  ;;  %v173_v46 = vmul.f32 %v62_v38, %v931_v11 }
  0x2b   :  { %788 = vmatprep.mubr.msk.bf16.mxu0 %vm271_vm0, %v227_v44  ;;  %v140_v47 = vand.u32 2147483647, %v108_v3  ;;  %v141_v48 = vand.u32 2147483647, %v109_v8  ;;  %v120_v49 = vsub.f32 %v86_v39, %v926_v10  ;;  %v121_v50 = vsub.f32 %v86_v39, %v931_v11 }
  0x2c   :  { %v214_v51 = vsel %vm89_vm1, %v150_v14, %v182_v25  ;;  %v215_v52 = vsel %vm89_vm1, %v151_v40, %v183_v45  ;;  %v184_v53 = vmul.f32 %v86_v39, %v926_v10  ;;  %v185_v54 = vmul.f32 %v86_v39, %v931_v11 }
  0x2d   :  { %v233_v55 = vpack.c.bf16 %v215_v52, %v214_v51  ;;  %v204_v56 = vsel %vm89_vm1, %v140_v47, %v172_v13  ;;  %v205_v57 = vsel %vm89_vm1, %v141_v48, %v173_v46  ;;  %v152_v58 = vand.u32 2147483647, %v120_v49 }
  0x2e   :  { %v228_v59 = vpack.c.bf16 %v205_v57, %v204_v56  ;;  %v153_v60 = vand.u32 2147483647, %v121_v50  ;;  %v868_v11 = vmov 0.0   ;;  %v1162_v23 = vrot.slane %v1156_v9, %v919_v7 }
  0x2f   :  { %800 = vmatprep.mubr.msk.bf16.mxu1 %vm271_vm0, %v233_v55  ;;  %v216_v61 = vsel %vm89_vm1, %v152_v58, %v184_v53  ;;  %804 = vmatprep.subr.mxu1 %v868_v11  ;;  %vm672_vm3 = vcmask 253952   ;;  %vm697_vm4 = vcmask 1025  }
  0x30   :  { %v217_v10 = vsel %vm89_vm1, %v153_v60, %v185_v54  ;;  %805 = vmatpush3.msra.mxu1 %v589_v63 }
  0x31   :  { %v234_v62 = vpack.c.bf16 %v217_v10, %v216_v61  ;;  %806 = vmatprep.subr.mxu1 %v868_v11 }
  0x32   :  { %789 = vmatmul.mubr.msk.bf16.gmra.mxu0 %vm271_vm0, %v228_v59  ;;  %807 = vmatpush3.msra.mxu1 %v588_v0 }
  0x33   :  { %801 = vmatmul.mubr.msk.bf16.gmra.mxu1 %vm271_vm0, %v234_v62  ;;  %808 = vmatprep.subr.mxu1 %v868_v11 }
  0x34   :  { %809 = vmatpush3.msra.mxu1 %v587_v4  ;;  %820 = vmatprep.mubr.msk.f32.mxu1 %vm869_vm2, %v868_v11 }
  0x35   :  { %810 = vmatprep.subr.mxu1 %v868_v11 }
  0x36   :  { %811 = vmatpush3.msra.mxu1 %v586_v1 }
  0x37   :  { %812 = vmatprep.subr.mxu1 %v868_v11 }
  0x38   :  { %813 = vmatpush3.msra.mxu1 %v585_v2 }
  0x39   :  { %814 = vmatprep.subr.mxu1 %v868_v11 }
  0x3a   :  { %815 = vmatpush3.msra.mxu1 %v584_v5 }
  0x3b   :  { %816 = vmatprep.subr.mxu1 %v868_v11 }
  0x3c   :  { %817 = vmatpush3.msra.mxu1 %v583_v6 }
  0x3d   :  { %818 = vmatprep.subr.mxu1 %v868_v11 }
  0x3e   :  { %819 = vmatpush3.msra.mxu1 %v582_v21 }
  0xd2   :  { %v774_v15 = vpop.f32.mrf.mxu0 }
  0xd3   :  { %v363_v28 = vadd.f32 %v774_v15, %v1162_v23 }
  0xd4   :  { %v354_v16 = vpop.f32.mrf.mxu0 }
  0xd5   :  { %v355_v30 = vadd.f32 %v354_v16, %v1162_v23  ;;  %v483_v37 = vmax.f32 %v363_v28, 0.0 }
  0xd6   :  { %v775_v17 = vpop.f32.mrf.mxu0 }
  0xd7   :  { %v366_v12 = vadd.f32 %v775_v17, %v1162_v23  ;;  %v481_v41 = vmax.f32 %v355_v30, 0.0  ;;  %v515_v46 = vsel %vm271_vm0, %v483_v37, -inf }
  0xd8   :  { %v357_v18 = vpop.f32.mrf.mxu0 }
  0xd9   :  { %v358_v34 = vadd.f32 %v357_v18, %v1162_v23  ;;  %v484_v42 = vmax.f32 %v366_v12, 0.0  ;;  %v513_v50 = vsel %vm271_vm0, %v481_v41, -inf }
  0xda   :  { %v778_v19 = vpop.f32.mrf.mxu0 }
  0xdb   :  { %v379_v29 = vadd.f32 %v778_v19, %v1162_v23  ;;  %v482_v3 = vmax.f32 %v358_v34, 0.0  ;;  %v516_v51 = vsel %vm271_vm0, %v484_v42, -inf }
  0xdc   :  { %v370_v22 = vpop.f32.mrf.mxu0 }
  0xdd   :  { %v371_v33 = vadd.f32 %v370_v22, %v1162_v23  ;;  %v487_v38 = vmax.f32 %v379_v29, 0.0  ;;  %v1185_v60 = vsel %vm271_vm0, %v482_v3, -inf }
  0xde   :  { %v779_v24 = vpop.f32.mrf.mxu0  ;;  %v794_v20 = vpop.f32.mrf.mxu1 }
  0xdf   :  { %v382_v7 = vadd.f32 %v779_v24, %v1162_v23  ;;  %v443_v43 = vadd.f32 %v794_v20, %v1162_v23  ;;  %v485_v44 = vmax.f32 %v371_v33, 0.0  ;;  %v521_v47 = vsel %vm271_vm0, %v487_v38, -inf }
  0xe0   :  { %v373_v26 = vpop.f32.mrf.mxu0  ;;  %v434_v27 = vpop.f32.mrf.mxu1  ;;  %v522_v61 = vmax.f32 %v515_v46, %v521_v47 }
  0xe1   :  { %v374_v39 = vadd.f32 %v373_v26, %v1162_v23  ;;  %v488_v8 = vmax.f32 %v382_v7, 0.0  ;;  %v503_v52 = vmax.f32 %v443_v43, 0.0  ;;  %v435_v53 = vadd.f32 %v434_v27, %v1162_v23 }
  0xe2   :  { %v782_v31 = vpop.f32.mrf.mxu0  ;;  %v795_v32 = vpop.f32.mrf.mxu1  ;;  %v517_v56 = vsel %vm271_vm0, %v485_v44, -inf }
  0xe3   :  { %v395_v45 = vadd.f32 %v782_v31, %v1162_v23  ;;  %v486_v48 = vmax.f32 %v374_v39, 0.0  ;;  %v446_v58 = vadd.f32 %v795_v32, %v1162_v23  ;;  %v523_v10 = vsel %vm271_vm0, %v488_v8, -inf }
  0xe4   :  { %v386_v35 = vpop.f32.mrf.mxu0  ;;  %v437_v36 = vpop.f32.mrf.mxu1  ;;  %v518_v5 = vmax.f32 %v513_v50, %v517_v56  ;;  %v1194_v6 = vsel %vm271_vm0, %v503_v52, -inf  ;;  %v501_v21 = vmax.f32 %v435_v53, 0.0  ;;  %v524_v20 = vmax.f32 %v516_v51, %v523_v10 }
  0xe5   :  { %v387_v14 = vadd.f32 %v386_v35, %v1162_v23  ;;  %v491_v57 = vmax.f32 %v395_v45, 0.0  ;;  %v1189_v0 = vsel %vm271_vm0, %v486_v48, -inf  ;;  %v1197_v15 = vadd.f32 %v437_v36, %v1162_v23 }
  0xe6   :  { %v783_v25 = vpop.f32.mrf.mxu0  ;;  %v504_v18 = vmax.f32 %v446_v58, 0.0  ;;  %v520_v26 = vmax.f32 %v1185_v60, %v1189_v0  ;;  %v1210_v34 = vsel %vm271_vm0, %v501_v21, -inf }
  0xe7   :  { %v398_v49 = vadd.f32 %v783_v25, %v1162_v23  ;;  %v489_v62 = vmax.f32 %v387_v14, 0.0  ;;  %v529_v17 = vsel %vm271_vm0, %v491_v57, -inf  ;;  %v502_v7 = vmax.f32 %v1197_v15, 0.0 }
  0xe8   :  { %v389_v40 = vpop.f32.mrf.mxu0  ;;  %v798_v13 = vpop.f32.mrf.mxu1  ;;  %v530_v33 = vmax.f32 %v522_v61, %v529_v17  ;;  %v555_v37 = vsel %vm271_vm0, %v504_v18, -inf }
  0xe9   :  { %v492_v4 = vmax.f32 %v398_v49, 0.0  ;;  %v390_v1 = vadd.f32 %v389_v40, %v1162_v23  ;;  %v525_v27 = vsel %vm271_vm0, %v489_v62, -inf  ;;  %v1205_v28 = vadd.f32 %v798_v13, %v1162_v23 }
  0xea   :  { %v786_v54 = vpop.f32.mrf.mxu0  ;;  %v450_v55 = vpop.f32.mrf.mxu1  ;;  %v526_v43 = vmax.f32 %v518_v5, %v525_v27 }
  0xeb   :  { %v411_v59 = vadd.f32 %v786_v54, %v1162_v23  ;;  %v531_v30 = vsel %vm271_vm0, %v492_v4, -inf  ;;  %v490_v12 = vmax.f32 %v390_v1, 0.0  ;;  %v451_v35 = vadd.f32 %v450_v55, %v1162_v23 }
  0xec   :  { %v402_v11 = vpop.f32.mrf.mxu0  ;;  %v799_v63 = vpop.f32.mrf.mxu1  ;;  %v532_v25 = vmax.f32 %v524_v20, %v531_v30  ;;  %v507_v44 = vmax.f32 %v1205_v28, 0.0 }
  0xed   :  { %v403_v2 = vadd.f32 %v402_v11, %v1162_v23  ;;  %v495_v19 = vmax.f32 %v411_v59, 0.0  ;;  %v527_v8 = vsel %vm271_vm0, %v490_v12, -inf  ;;  %v505_v48 = vmax.f32 %v451_v35, 0.0 }
  0xee   :  { %v787_v16 = vpop.f32.mrf.mxu0  ;;  %v453_v24 = vpop.f32.mrf.mxu1  ;;  %v462_v49 = vadd.f32 %v799_v63, %v1162_v23  ;;  %v528_v4 = vmax.f32 %v520_v26, %v527_v8  ;;  %v561_v30 = vsel %vm271_vm0, %v507_v44, -inf }
  0xef   :  { %v414_v22 = vadd.f32 %v787_v16, %v1162_v23  ;;  %v493_v31 = vmax.f32 %v403_v2, 0.0  ;;  %v537_v38 = vsel %vm271_vm0, %v495_v19, -inf  ;;  %v454_v50 = vadd.f32 %v453_v24, %v1162_v23 }
  0xf0   :  { %v405_v29 = vpop.f32.mrf.mxu0  ;;  %v538_v47 = vmax.f32 %v530_v33, %v537_v38  ;;  %v508_v2 = vmax.f32 %v462_v49, 0.0 }
  0xf1   :  { %v406_v32 = vadd.f32 %v405_v29, %v1162_v23  ;;  %v496_v39 = vmax.f32 %v414_v22, 0.0  ;;  %v533_v14 = vsel %vm271_vm0, %v493_v31, -inf  ;;  %v506_v20 = vmax.f32 %v454_v50, 0.0 }
  0xf2   :  { %v790_v36 = vpop.f32.mrf.mxu0  ;;  %v534_v57 = vmax.f32 %v526_v43, %v533_v14  ;;  %v551_v29 = vsel %vm271_vm0, %v502_v7, -inf }
  0xf3   :  { %v427_v41 = vadd.f32 %v790_v36, %v1162_v23  ;;  %v802_v42 = vpop.f32.mrf.mxu1  ;;  %v494_v45 = vmax.f32 %v406_v32, 0.0  ;;  %v539_v52 = vsel %vm271_vm0, %v496_v39, -inf  ;;  %v557_v32 = vsel %vm271_vm0, %v505_v48, -inf }
  0xf4   :  { %v418_v3 = vpop.f32.mrf.mxu0  ;;  %v475_v60 = vadd.f32 %v802_v42, %v1162_v23  ;;  %v540_v1 = vmax.f32 %v532_v25, %v539_v52  ;;  %v559_v39 = vsel %vm271_vm0, %v506_v20, -inf }
  0xf5   :  { %v499_v40 = vmax.f32 %v427_v41, 0.0  ;;  %v419_v13 = vadd.f32 %v418_v3, %v1162_v23  ;;  %v466_v46 = vpop.f32.mrf.mxu1  ;;  %v535_v58 = vsel %vm271_vm0, %v494_v45, -inf }
  0xf6   :  { %v791_v51 = vpop.f32.mrf.mxu0  ;;  %v467_v21 = vadd.f32 %v466_v46, %v1162_v23  ;;  %v536_v18 = vmax.f32 %v528_v4, %v535_v58  ;;  %v511_v27 = vmax.f32 %v475_v60, 0.0 }
  0xf7   :  { %v545_v53 = vsel %vm271_vm0, %v499_v40, -inf  ;;  %v497_v54 = vmax.f32 %v419_v13, 0.0  ;;  %v430_v55 = vadd.f32 %v791_v51, %v1162_v23  ;;  %v803_v56 = vpop.f32.mrf.mxu1  ;;  %v592_v51 = vpop.permute.xlu0 %591 }
  0xf8   :  { %v546_v59 = vmax.f32 %v538_v47, %v545_v53  ;;  %v421_v61 = vpop.f32.mrf.mxu0  ;;  %v478_v11 = vadd.f32 %v803_v56, %v1162_v23  ;;  %v509_v33 = vmax.f32 %v467_v21, 0.0  ;;  %v569_v41 = vsel %vm271_vm0, %v511_v27, -inf }
  0xf9   :  { %v541_v10 = vsel %vm271_vm0, %v497_v54, -inf  ;;  %v500_v62 = vmax.f32 %v430_v55, 0.0  ;;  %v422_v63 = vadd.f32 %v421_v61, %v1162_v23  ;;  %v469_v0 = vpop.f32.mrf.mxu1 }
  0xfa   :  { %v542_v5 = vmax.f32 %v534_v57, %v541_v10  ;;  %v470_v17 = vadd.f32 %v469_v0, %v1162_v23  ;;  %v554_v19 = vmax.f32 %v546_v59, %v1194_v6  ;;  %v512_v28 = vmax.f32 %v478_v11, 0.0 }
  0xfb   :  { %v547_v15 = vsel %vm271_vm0, %v500_v62, -inf  ;;  %v498_v16 = vmax.f32 %v422_v63, 0.0  ;;  %v563_v23 = vsel %vm271_vm0, %v508_v2, -inf  ;;  %v669_v55 = vpop.permute.xlu0 %668  ;;  %v676_v59 = vrot.slane %v1156_v9, 1 }
  0xfc   :  { %v550_v22 = vmax.f32 %v542_v5, %v1210_v34  ;;  %v548_v24 = vmax.f32 %v540_v1, %v547_v15  ;;  %v510_v6 = vmax.f32 %v470_v17, 0.0  ;;  %v562_v35 = vmax.f32 %v554_v19, %v561_v30 }
  0xfd   :  { %v543_v26 = vsel %vm271_vm0, %v498_v16, -inf  ;;  %v571_v7 = vsel %vm271_vm0, %v512_v28, -inf  ;;  %v679_v11 = vsub.f32 0.0, %v1156_v9 }
  0xfe   :  { %v556_v12 = vmax.f32 %v548_v24, %v555_v37  ;;  %v544_v31 = vmax.f32 %v536_v18, %v543_v26  ;;  %v558_v34 = vmax.f32 %v550_v22, %v557_v32  ;;  %v565_v37 = vsel %vm271_vm0, %v509_v33, -inf }
  0xff   :  { %v567_v25 = vsel %vm271_vm0, %v510_v6, -inf  ;;  %v570_v44 = vmax.f32 %v562_v35, %v569_v41 }
 0x100   :  { %v564_v36 = vmax.f32 %v556_v12, %v563_v23  ;;  %v552_v38 = vmax.f32 %v544_v31, %v551_v29  ;;  %v566_v45 = vmax.f32 %v558_v34, %v565_v37 }
 0x102   :  { %v572_v42 = vmax.f32 %v564_v36, %v571_v7  ;;  %v560_v43 = vmax.f32 %v552_v38, %v559_v39 }
 0x104   :  { %v568_v3 = vmax.f32 %v560_v43, %v567_v25  ;;  %v574_v8 = vmax.f32 %v570_v44, %v572_v42 }
 0x106   :  { %v573_v14 = vmax.f32 %v566_v45, %v568_v3 }
 0x108   :  { %v575_v40 = vmax.f32 %v573_v14, %v574_v8 }
 0x10a   :  { %v576_v13 = vrot.slane %v575_v40, 4 }
 0x10c   :  { %v577_v46 = vmax.f32 %v575_v40, %v576_v13 }
 0x10e   :  { %v578_v47 = vrot.slane %v577_v46, 2 }
 0x110   :  { %v579_v48 = vmax.f32 %v577_v46, %v578_v47 }
 0x112   :  { %v580_v49 = vrot.slane %v579_v48, 1 }
 0x114   :  { %v581_v50 = vmax.f32 %v579_v48, %v580_v49 }
 0x116   :  { %821 = vmatmul.mubr.msk.f32.vlgmr.msra.gmra.mxu1 %vm271_vm0, %v581_v50 }
 0x1d6   :  { %v663_v52 = vpop.f32.mrf.mxu1 }
 0x1d7   :  { %v664_v53 = vadd.f32 %v663_v52, %v592_v51 }
 0x1d8   :  { %v822_v54 = vpop.f32.mrf.mxu1 }
 0x1d9   :  { %v667_v56 = vmax.f32 %v664_v53, 0.0 }
 0x1db   :  { %v671_v57 = vmul.f32 %v669_v55, %v667_v56 }
 0x1dd   :  { %v673_v58 = vsel %vm672_vm3, %v671_v57, 0.0 }
 0x1de   :  { %674 = vadd.xlane.f32.xlu1 %v673_v58 }
 0x267   :  { %v675_v60 = vpop.xlane.xlu1 %674 }
 0x268   :  { %v678_v61 = vadd.f32 %v676_v59, %v675_v60 }
 0x26a   :  { %v734_v10 = vadd.f32 -0.5, %v678_v61 }
 0x26c   :  { %v682_v62 = vrot.slane %v734_v10, 7 }
 0x26e   :  { %683 = vrot.lane.b32.xlu1 %v682_v62, %s872_s2 }
 0x2e0   :  { %v684_v63 = vpop.permute.xlu1 %683 }
 0x2e1   :  { %v686_v0 = vmul.f32 %v684_v63, %v679_v11 }
 0x2e3   :  { %v687_v4 = vmul.f32 1.442695, %v686_v0 }
 0x2e5   :  { %842 = vpow2.f32 %v687_v4 }
 0x2f2   :  { %v843_v1 = vpop.eup %842 }
 0x2f3   :  { %v689_v2 = vadd.f32 1.0, %v843_v1 }
 0x2f5   :  { %844 = vrcp.f32 %v689_v2 }
 0x302   :  { %v845_v5 = vpop.eup %844 }
 0x303   :  { %v691_v21 = vmax.f32 %v845_v5, 0.0 }
 0x305   :  { %v692_v15 = vmin.f32 %v691_v21, 1.0 }
 0x307   :  { %694 = vrot.lane.b32.xlu0 %v692_v15, %s873_s3 }
 0x379   :  { %v695_v16 = vpop.permute.xlu0 %694 }
 0x37a   :  { %698 = vst.msk [vmem:[#allocation2 - $0x1] sm:$0x2] %vm697_vm4, %v695_v16 }
 0x37b   :  { %857 = shalt.err (!%p854_p4)
}
 0x37c   :  { %708 = dma.vmem_to_hbm [thread:$0]  %s706_s24, 16, %s1256_s4, [#allocation3]  }
 0x37d   :  { %866 = dma.done.wait [#allocation3], 16  }
 0x37e   :  { %867 = vsyncadd [#allocation3], 4294967280 }
 0x37f   :  { %712 = vsyncpa [#allocation3], 1 }

</bundles_post_ra>
